<compile_context>
chip_gen: v7x
topology: tpu7x:2x2x1
jax: 0.10.0
libtpu: 0.0.40
codegen_flags: <defaults>
</compile_context>

<pallas_src>
import functools

import jax
import jax.numpy as jnp
from jax.experimental import pallas as pl
from jax.experimental.pallas import tpu as pltpu

TEMPERATURE = 0.07


def fused_contrastive_kernel(x_ref, w_ref, b_ref, o_ref, *, temperature):
    """Fused g_net (ReLU -> Linear) + InfoNCE for the single surviving chunk.

    x_ref : (id_cnt, D)   VMEM -- the id_cnt views of the LAST sample, gathered
                                  straight from HBM by the BlockSpec index_map.
    w_ref : (D_out, D_in) VMEM -- nn.Linear weight, UNtransposed.
    b_ref : (1, D_out)    VMEM
    o_ref : (1, 1)        VMEM -- scalar loss.
    """
    x = jnp.maximum(x_ref[...], 0.0)                                   # ReLU (VPU)

    # nn.Linear: z = relu(x) @ W^T + b.  W arrives as stored (out, in); contract
    # x dim 1 with W dim 1 so the transpose happens inside the MXU contraction
    # and the wrapper never materializes weight.T.
    z = jax.lax.dot_general(
        x, w_ref[...], (((1,), (1,)), ((), ())),
        preferred_element_type=jnp.float32) + b_ref[...]               # (k, D)
    k = z.shape[0]

    # F.cosine_similarity(z[:,None,:], z[None,:,:], dim=-1): normalize rows with
    # rsqrt (EUP slot).  NOTE: PyTorch clamps ||z_i||*||z_j|| at eps=1e-8; we
    # clamp each row norm (squared, at 1e-16) -- identical unless a norm < 1e-8.
    nrm_sq = jnp.sum(z * z, axis=-1, keepdims=True)                    # (k, 1)
    zn = z * jax.lax.rsqrt(jnp.maximum(nrm_sq, jnp.float32(1e-16)))    # (k, D)
    cos = jax.lax.dot_general(
        zn, zn, (((1,), (1,)), ((), ())),
        preferred_element_type=jnp.float32)                            # (k, k)

    row = jax.lax.broadcasted_iota(jnp.int32, (k, k), 0)
    col = jax.lax.broadcasted_iota(jnp.int32, (k, k), 1)

    # masked_fill_ of the diagonal happens BEFORE dividing by temperature,
    # exactly as in the reference.
    cos = jnp.where(row == col, jnp.float32(-9e15), cos)
    cos = cos / jnp.float32(temperature)

    # pos_mask = eye(k).roll(shifts=k//2, dims=0): row i's positive is column
    # (i - k//2) mod k; boolean indexing returns them in row order.
    pos_col = (row + (k - k // 2)) % k
    pos = jnp.sum(jnp.where(col == pos_col, cos, 0.0), axis=-1, keepdims=True)

    # logsumexp over dim=-1 (exp/log live on the EUP slot).
    m = jnp.max(cos, axis=-1, keepdims=True)
    lse = m + jnp.log(jnp.sum(jnp.exp(cos - m), axis=-1, keepdims=True))

    o_ref[...] = jnp.reshape(jnp.sum(lse - pos) * (1.0 / k), (1, 1))   # .mean()


def contrastive_loss(metas, weight, bias, temperature=TEMPERATURE):
    """metas: list of id_cnt arrays of shape (N, D), or a pre-stacked
    (N, id_cnt, D) slab in the reference's 'n k c' layout.
    weight: (D, D) nn.Linear weight as stored (out, in).  bias: (D,)."""
    if isinstance(metas, (list, tuple)):
        # One concatenate (same as torch.stack in the reference).  Callers that
        # already hold the 'n k c' slab can pass it directly and skip even this.
        x = jnp.stack(metas, axis=1)                       # (N, id_cnt, D)
    else:
        x = metas
    n, id_cnt, dim = x.shape
    b2 = bias.reshape(1, dim)                              # free layout change

    cost = pl.CostEstimate(
        flops=2 * id_cnt * dim * dim + 2 * id_cnt * id_cnt * dim,
        transcendentals=id_cnt * id_cnt + 2 * id_cnt,
        bytes_accessed=(id_cnt * dim + dim * dim + dim + 1) * 4,
    )

    loss = pl.pallas_call(
        functools.partial(fused_contrastive_kernel, temperature=temperature),
        out_shape=jax.ShapeDtypeStruct((1, 1), jnp.float32),
        grid=(1,),
        in_specs=[
            # Gather ONLY row n-1 of the 'n k c' slab (the single chunk that
            # contributes to the returned loss) straight from HBM: block
            # (1, id_cnt, D) at (n-1, 0, 0), leading sample axis squeezed.
            pl.BlockSpec((None, id_cnt, dim), lambda i: (n - 1, 0, 0)),
            pl.BlockSpec((dim, dim), lambda i: (0, 0)),
            pl.BlockSpec((1, dim), lambda i: (0, 0)),
        ],
        out_specs=pl.BlockSpec((1, 1), lambda i: (0, 0)),
        compiler_params=pltpu.CompilerParams(dimension_semantics=("arbitrary",)),
        cost_estimate=cost,
    )(x, weight, b2)

    return loss[0, 0]


def _reference_loss(metas_list, weight, bias, temperature):
    """Literal jnp transcription of the PyTorch forward (including the
    `nll = ...` overwrite, so only chunk n-1 survives)."""
    hi = jax.lax.Precision.HIGHEST
    x = jnp.stack(metas_list)                  # (id_cnt, N, D)
    x = jnp.transpose(x, (1, 0, 2))            # (N, id_cnt, D) == 'n k c'
    n, k, d = x.shape
    h = jnp.maximum(x.reshape(n * k, d), 0.0)
    z = jnp.dot(h, weight.T, precision=hi) + bias
    z = z.reshape(n, k, d)
    eye = jnp.eye(k, dtype=bool)
    pos_mask = jnp.roll(eye, k // 2, axis=0)
    nll = jnp.float32(0.0)
    for i in range(n):
        zi = z[i]
        nrm = jnp.sqrt(jnp.sum(zi * zi, axis=-1))
        cos = jnp.dot(zi, zi.T, precision=hi) / jnp.maximum(
            nrm[:, None] * nrm[None, :], 1e-8)
        cos = jnp.where(eye, -9e15, cos)
        cos = cos / temperature
        pos = jnp.sum(jnp.where(pos_mask, cos, 0.0), axis=-1)
        nll = (-pos + jax.nn.logsumexp(cos, axis=-1)).mean()
    return nll


if __name__ == "__main__":
    key = jax.random.PRNGKey(0)

    # Small shapes consistent with the module: metas = (1+diff+1+diff) x (N, D).
    meta_dim = 128
    n = 4               # N samples
    diff = 3
    id_cnt = 1 + diff + 1 + diff   # 8 views per identity

    k_w, k_b, k_m = jax.random.split(key, 3)

    # deterministic nn.Linear-style init: U(-1/sqrt(D), 1/sqrt(D))
    bound = 1.0 / (meta_dim ** 0.5)
    weight = jax.random.uniform(
        k_w, (meta_dim, meta_dim), jnp.float32, -bound, bound
    )
    bias = jax.random.uniform(k_b, (meta_dim,), jnp.float32, -bound, bound)

    metas = [
        jax.random.normal(jax.random.fold_in(k_m, i), (n, meta_dim), jnp.float32)
        for i in range(id_cnt)
    ]

    loss = contrastive_loss(metas, weight, bias)
    jax.block_until_ready(loss)

    ref = _reference_loss(metas, weight, bias, TEMPERATURE)
    assert loss.shape == () and bool(jnp.isfinite(loss))
    assert jnp.allclose(loss, ref, rtol=1e-3, atol=1e-3), (float(loss), float(ref))
    print("KERNEL_OK")
</pallas_src>

<mosaic_0001>
module attributes {stable_mosaic.version = 11 : i64} {
  func.func @fused_contrastive_kernel(%arg0: i32, %arg1: memref<1x8x128xf32, #tpu.memory_space<vmem>>, %arg2: memref<128x128xf32, #tpu.memory_space<vmem>>, %arg3: memref<1x128xf32, #tpu.memory_space<vmem>>, %arg4: memref<1x1xf32, #tpu.memory_space<vmem>>) attributes {dimension_semantics = [#tpu.dimension_semantics<arbitrary>], iteration_bounds = array<i64: 1>, scalar_prefetch = 0 : i64, scratch_operands = 0 : i64, tpu.core_type = #tpu.core_type<tc>, window_params = [{transform_indices = @transform_0, window_bounds = array<i64: 1, 8, 128>}, {pipeline_mode = #tpu.pipeline_mode<synchronous>, transform_indices = @transform_1, window_bounds = array<i64: 128, 128>}, {pipeline_mode = #tpu.pipeline_mode<synchronous>, transform_indices = @transform_2, window_bounds = array<i64: 1, 128>}, {pipeline_mode = #tpu.pipeline_mode<synchronous>, transform_indices = @transform_3, window_bounds = array<i64: 1, 1>}]} {
    %c0 = arith.constant 0 : index
    %c0_0 = arith.constant 0 : index
    %c0_1 = arith.constant 0 : index
    %0 = vector.load %arg1[%c0, %c0_0, %c0_1] : memref<1x8x128xf32, #tpu.memory_space<vmem>>, vector<1x8x128xf32>
    %1 = vector.shape_cast %0 : vector<1x8x128xf32> to vector<8x128xf32>
    %cst = arith.constant 0.000000e+00 : f32
    %2 = vector.broadcast %cst : f32 to vector<8x128xf32>
    %3 = arith.maximumf %1, %2 : vector<8x128xf32>
    %c0_2 = arith.constant 0 : index
    %c0_3 = arith.constant 0 : index
    %4 = vector.load %arg2[%c0_2, %c0_3] : memref<128x128xf32, #tpu.memory_space<vmem>>, vector<128x128xf32>
    %cst_4 = arith.constant dense<0.000000e+00> : vector<8x128xf32>
    %5 = tpu.matmul %3, %4, %cst_4 {dimension_numbers = #tpu.dot_dimension_numbers<[1], [1], [0], [0], [0, 0, 1, 0], [], []>} : vector<8x128xf32>, vector<128x128xf32>, vector<8x128xf32> -> vector<8x128xf32>
    %c0_5 = arith.constant 0 : index
    %c0_6 = arith.constant 0 : index
    %6 = vector.load %arg3[%c0_5, %c0_6] : memref<1x128xf32, #tpu.memory_space<vmem>>, vector<1x128xf32>
    %7 = vector.broadcast %6 : vector<1x128xf32> to vector<8x128xf32>
    %8 = arith.addf %5, %7 : vector<8x128xf32>
    %9 = arith.mulf %8, %8 : vector<8x128xf32>
    %cst_7 = arith.constant dense<0.000000e+00> : vector<8xf32>
    %10 = vector.multi_reduction <add>, %9, %cst_7 [1] : vector<8x128xf32> to vector<8xf32>
    %11 = vector.shape_cast %10 : vector<8xf32> to vector<8x1xf32>
    %cst_8 = arith.constant 1.000000e-16 : f32
    %12 = vector.broadcast %cst_8 : f32 to vector<8x1xf32>
    %13 = arith.maximumf %11, %12 : vector<8x1xf32>
    %14 = math.rsqrt %13 : vector<8x1xf32>
    %15 = vector.broadcast %14 : vector<8x1xf32> to vector<8x128xf32>
    %16 = arith.mulf %8, %15 : vector<8x128xf32>
    %cst_9 = arith.constant dense<0.000000e+00> : vector<8x8xf32>
    %17 = tpu.matmul %16, %16, %cst_9 {dimension_numbers = #tpu.dot_dimension_numbers<[1], [1], [0], [0], [0, 0, 1, 0], [], []>} : vector<8x128xf32>, vector<8x128xf32>, vector<8x8xf32> -> vector<8x8xf32>
    %18 = tpu.iota {dimensions = array<i32: 0>} : vector<8x8xi32>
    %19 = tpu.iota {dimensions = array<i32: 1>} : vector<8x8xi32>
    %20 = arith.cmpi eq, %18, %19 : vector<8x8xi32>
    %cst_10 = arith.constant -9.000000e+15 : f32
    %21 = vector.broadcast %cst_10 : f32 to vector<8x8xf32>
    %22 = arith.select %20, %21, %17 : vector<8x8xi1>, vector<8x8xf32>
    %cst_11 = arith.constant 7.000000e-02 : f32
    %23 = vector.broadcast %cst_11 : f32 to vector<8x8xf32>
    %24 = arith.divf %22, %23 : vector<8x8xf32>
    %c4_i32 = arith.constant 4 : i32
    %25 = vector.broadcast %c4_i32 : i32 to vector<8x8xi32>
    %26 = arith.addi %18, %25 : vector<8x8xi32>
    %c8_i32 = arith.constant 8 : i32
    %c0_i32 = arith.constant 0 : i32
    %27 = arith.cmpi eq, %c8_i32, %c0_i32 : i32
    %c1_i32 = arith.constant 1 : i32
    %28 = arith.select %27, %c1_i32, %c8_i32 : i32
    %29 = vector.broadcast %28 : i32 to vector<8x8xi32>
    %30 = arith.remsi %26, %29 : vector<8x8xi32>
    %c0_i32_12 = arith.constant 0 : i32
    %31 = vector.broadcast %c0_i32_12 : i32 to vector<8x8xi32>
    %32 = arith.cmpi ne, %30, %31 : vector<8x8xi32>
    %c0_i32_13 = arith.constant 0 : i32
    %33 = vector.broadcast %c0_i32_13 : i32 to vector<8x8xi32>
    %34 = arith.cmpi slt, %30, %33 : vector<8x8xi32>
    %c0_i32_14 = arith.constant 0 : i32
    %35 = arith.cmpi slt, %28, %c0_i32_14 : i32
    %36 = vector.broadcast %35 : i1 to vector<8x8xi1>
    %37 = vector.broadcast %36 : vector<8x8xi1> to vector<8x8xi1>
    %38 = arith.xori %34, %37 : vector<8x8xi1>
    %39 = arith.andi %38, %32 : vector<8x8xi1>
    %40 = vector.broadcast %28 : i32 to vector<8x8xi32>
    %41 = arith.addi %30, %40 : vector<8x8xi32>
    %42 = arith.select %39, %41, %30 : vector<8x8xi1>, vector<8x8xi32>
    %43 = arith.cmpi eq, %19, %42 : vector<8x8xi32>
    %cst_15 = arith.constant 0.000000e+00 : f32
    %44 = vector.broadcast %cst_15 : f32 to vector<8x8xf32>
    %45 = arith.select %43, %24, %44 : vector<8x8xi1>, vector<8x8xf32>
    %cst_16 = arith.constant dense<0.000000e+00> : vector<8xf32>
    %46 = vector.multi_reduction <add>, %45, %cst_16 [1] : vector<8x8xf32> to vector<8xf32>
    %47 = vector.shape_cast %46 : vector<8xf32> to vector<8x1xf32>
    %cst_17 = arith.constant dense<0xFF800000> : vector<8xf32>
    %48 = vector.multi_reduction <maximumf>, %24, %cst_17 [1] : vector<8x8xf32> to vector<8xf32>
    %49 = vector.shape_cast %48 : vector<8xf32> to vector<8x1xf32>
    %50 = vector.broadcast %49 : vector<8x1xf32> to vector<8x8xf32>
    %51 = arith.subf %24, %50 : vector<8x8xf32>
    %52 = math.exp %51 : vector<8x8xf32>
    %cst_18 = arith.constant dense<0.000000e+00> : vector<8xf32>
    %53 = vector.multi_reduction <add>, %52, %cst_18 [1] : vector<8x8xf32> to vector<8xf32>
    %54 = vector.shape_cast %53 : vector<8xf32> to vector<8x1xf32>
    %55 = math.log %54 : vector<8x1xf32>
    %56 = arith.addf %49, %55 : vector<8x1xf32>
    %57 = arith.subf %56, %47 : vector<8x1xf32>
    %58 = vector.shape_cast %57 : vector<8x1xf32> to vector<1x8x1xf32>
    %cst_19 = arith.constant dense<0.000000e+00> : vector<1xf32>
    %59 = vector.multi_reduction <add>, %58, %cst_19 [1, 2] : vector<1x8x1xf32> to vector<1xf32>
    %60 = vector.shape_cast %59 : vector<1xf32> to vector<1x1x1xf32>
    %61 = vector.extract %60[0, 0, 0] : f32 from vector<1x1x1xf32>
    %cst_20 = arith.constant 1.250000e-01 : f32
    %62 = arith.mulf %61, %cst_20 : f32
    %63 = vector.broadcast %62 : f32 to vector<1x1xf32>
    %c0_21 = arith.constant 0 : index
    %c0_22 = arith.constant 0 : index
    %64 = vector.load %arg4[%c0_21, %c0_22] : memref<1x1xf32, #tpu.memory_space<vmem>>, vector<1x1xf32>
    tpu.vector_store %arg4[%c0_21, %c0_22], %63 {strides = array<i32>} : memref<1x1xf32, #tpu.memory_space<vmem>>, vector<1x1xf32>,
    return
  }
  func.func @transform_0(%arg0: i32) -> (i32, i32, i32) {
    %c3_i32 = arith.constant 3 : i32
    %c0_i32 = arith.constant 0 : i32
    %c0_i32_0 = arith.constant 0 : i32
    %c0_i32_1 = arith.constant 0 : i32
    return %c3_i32, %c0_i32, %c0_i32_0 : i32, i32, i32
  }
  func.func @transform_1(%arg0: i32) -> (i32, i32) {
    %c0_i32 = arith.constant 0 : i32
    %c0_i32_0 = arith.constant 0 : i32
    %c0_i32_1 = arith.constant 0 : i32
    return %c0_i32, %c0_i32_0 : i32, i32
  }
  func.func @transform_2(%arg0: i32) -> (i32, i32) {
    %c0_i32 = arith.constant 0 : i32
    %c0_i32_0 = arith.constant 0 : i32
    %c0_i32_1 = arith.constant 0 : i32
    return %c0_i32, %c0_i32_0 : i32, i32
  }
  func.func @transform_3(%arg0: i32) -> (i32, i32) {
    %c0_i32 = arith.constant 0 : i32
    %c0_i32_0 = arith.constant 0 : i32
    %c0_i32_1 = arith.constant 0 : i32
    return %c0_i32, %c0_i32_0 : i32, i32
  }
}

</mosaic_0001>

<bundles_post_ra>
// kernel: tpu_custom_call.1
= control target key start
LH: loop header
LB: loop body
LE: loop exit
PB: predicated region body
PF: predicated region fallthrough
CT: control target
= control target key end

     0   :  { %8 = vsyncpa [#allocation3], 0  ;;  %s529_s0 = inlined_call_operand.hbm [shape: f32[4,8,128], index: 0, kind: input, shape index: {}]   ;;  %s530_s1 = inlined_call_operand.hbm [shape: f32[128,128], index: 1, kind: input, shape index: {}]   ;;  %s531_s2 = inlined_call_operand.vmem [shape: f32[1,128], index: 2, kind: input, shape index: {}]   ;;  %s532_s3 = inlined_call_operand.hbm [shape: f32[1,1], index: 3, kind: output, shape index: {}]  }
   0x1   :  { %9 = vsyncpa [#allocation6], 0 }
   0x2   :  { %10 = vsyncpa [#allocation4], 0  ;;  %s16_s14 = scalar_lea.hbm %s529_s0, 384  ;;  %s459_s15 = smov [#allocation2]  }
   0x3   :  { %s18_s16 = sshll.u32 %s459_s15, 4  ;;  %s460_s17 = smov [#allocation5]   ;;  %s19_s16 = int_to_ptr.vmem [resolvable:$true] %s18_s16 }
   0x4   :  { %s27_s18 = sshll.u32 %s460_s17, 4  ;;  %s408_s21 = scalar_lea.hbm %s529_s0, 512  ;;  %s28_s18 = int_to_ptr.vmem [resolvable:$true] %s27_s18 }
   0x5   :  { %p385_p0 = scmp.ne.s32.totalorder %s16_s14, %s408_s21  ;;  %p387_p1 = scmp.lt.u32.totalorder %s16_s14, %s529_s0 }
   0x6   :  { %p388_p2 = scmp.lt.u32.totalorder %s408_s21, %s408_s21  ;;  %p390_p4 = scmp.lt.u32.totalorder %s408_s21, %s16_s14 }
   0x8   :  { %p389_p3 = por %p388_p2, %p387_p1 }
   0xa   :  { %p391_p5 = por %p390_p4, %p389_p3 }
   0xc   :  { %p392_p6 = pnand %p391_p5, %p385_p0 }
   0xe   :  { %395 = shalt.err (!%p392_p6)
}
   0xf   :  { %s396_s24 = scalar_lea.vmem %s19_s16, 128  ;;  %p401_p8 = scmp.lt.s32.totalorder %s19_s16, %s19_s16 }
  0x10   :  { %p397_p7 = scmp.ne.s32.totalorder %s19_s16, %s396_s24  ;;  %p402_p9 = scmp.lt.s32.totalorder %s396_s24, %s396_s24 }
  0x12   :  { %p403_p10 = por %p402_p9, %p401_p8 }
  0x14   :  { %p404_p11 = pnand %p403_p10, %p397_p7 }
  0x16   :  { %407 = shalt.err (!%p404_p11)
}
  0x17   :  { %21 = dma.hbm_to_vmem [thread:$0]  %s16_s14, 128, %s19_s16, [#allocation3]  }
  0x18   :  { %s409_s27 = scalar_lea.hbm %s530_s1, 2048 }
  0x19   :  { %p410_p12 = scmp.ne.s32.totalorder %s530_s1, %s409_s27  ;;  %p413_p13 = scmp.lt.u32.totalorder %s409_s27, %s530_s1 }
  0x1b   :  { %p415_p0 = pnand %p413_p13, %p410_p12 }
  0x1d   :  { %418 = shalt.err (!%p415_p0)
}
  0x1e   :  { %s419_s4 = scalar_lea.vmem %s28_s18, 2048  ;;  %p424_p2 = scmp.lt.s32.totalorder %s28_s18, %s28_s18 }
  0x1f   :  { %p420_p1 = scmp.ne.s32.totalorder %s28_s18, %s419_s4  ;;  %p425_p3 = scmp.lt.s32.totalorder %s419_s4, %s419_s4 }
  0x21   :  { %p426_p4 = por %p425_p3, %p424_p2 }
  0x23   :  { %p427_p5 = pnand %p426_p4, %p420_p1 }
  0x25   :  { %430 = shalt.err (!%p427_p5)
}
  0x26   :  { %s461_s5 = smov 128   ;;  %s462_s6 = smov 8  }
  0x27   :  { %33 = dma.hbm_to_vmem [thread:$0]  %s530_s1, 2048, %s28_s18, [#allocation6], %s461_s5, %s461_s5, %s462_s6  }
  0x28   :  { %453 = dma.done.wait [#allocation3], 128  }
  0x29   :  { %454 = vsyncadd [#allocation3], 4294967168 }
  0x2a   :  { %455 = dma.done.wait [#allocation6], 2048  }
  0x2b   :  { %456 = vsyncadd [#allocation6], 4294965248  ;;  %v463_v0 = vmov 0.0|0.0   ;;  %vm464_vm0 = vmmov 0   ;;  %v465_v1 = vmov 0.0   ;;  %v44_v2 = vld [vmem:[#allocation5] sm:$0xff]  ;;  %v213_v37 = vlaneseq }
  0x2c   :  { %344 = vmatprep.subr.bf16.mxu0 %v463_v0  ;;  %336 = vmatprep.mubr.msk.f32.mxu0 %vm464_vm0, %v465_v1  ;;  %v45_v3 = vld [vmem:[#allocation5 + $0x8] sm:$0xff]  ;;  %v46_v5 = vld [vmem:[#allocation5 + $0x10] sm:$0xff]  ;;  %v47_v6 = vld [vmem:[#allocation5 + $0x18] sm:$0xff]  ;;  %vm236_vm3 = vcmask 64512   ;;  %vm253_vm4 = vcmask 7168   ;;  %vm266_vm5 = vcmask 0  }
  0x2d   :  { %339 = vmatprep.subr.mxu1 %v465_v1  ;;  %341 = vmatprep.mubr.msk.f32.mxu1 %vm464_vm0, %v465_v1  ;;  %v345_v4 = vpack.c.bf16 %v45_v3, %v44_v2  ;;  %v348_v7 = vpack.c.bf16 %v47_v6, %v46_v5  ;;  %v48_v8 = vld [vmem:[#allocation5 + $0x20] sm:$0xff]  ;;  %v49_v9 = vld [vmem:[#allocation5 + $0x28] sm:$0xff]  ;;  %v50_v11 = vld [vmem:[#allocation5 + $0x30] sm:$0xff]  ;;  %v214_v38 = vshrl.u32 %v213_v37, 7  ;;  %v216_v40 = vand.u32 127, %v213_v37 }
  0x2e   :  { %v351_v10 = vpack.c.bf16 %v49_v9, %v48_v8  ;;  %v51_v12 = vld [vmem:[#allocation5 + $0x38] sm:$0xff]  ;;  %v52_v14 = vld [vmem:[#allocation5 + $0x40] sm:$0xff]  ;;  %v53_v15 = vld [vmem:[#allocation5 + $0x48] sm:$0xff] }
  0x2f   :  { %346 = vmatpush3.bf16.xpose.msra.mxu0 %v345_v4  ;;  %v354_v13 = vpack.c.bf16 %v51_v12, %v50_v11  ;;  %v357_v16 = vpack.c.bf16 %v53_v15, %v52_v14  ;;  %v54_v17 = vld [vmem:[#allocation5 + $0x50] sm:$0xff]  ;;  %v55_v18 = vld [vmem:[#allocation5 + $0x58] sm:$0xff]  ;;  %v56_v20 = vld [vmem:[#allocation5 + $0x60] sm:$0xff]  ;;  %v221_v39 = vadd.s32 4, %v214_v38  ;;  %vm217_vm2 = vcmp.eq.s32.totalorder %v214_v38, %v216_v40 }
  0x30   :  { %347 = vmatprep.subr.bf16.mxu0 %v463_v0  ;;  %v360_v19 = vpack.c.bf16 %v55_v18, %v54_v17  ;;  %v57_v21 = vld [vmem:[#allocation5 + $0x68] sm:$0xff]  ;;  %v58_v23 = vld [vmem:[#allocation5 + $0x70] sm:$0xff]  ;;  %v59_v24 = vld [vmem:[#allocation5 + $0x78] sm:$0xff] }
  0x31   :  { %v363_v22 = vpack.c.bf16 %v57_v21, %v56_v20  ;;  %v366_v25 = vpack.c.bf16 %v59_v24, %v58_v23  ;;  %v42_v26 = vld [vmem:[#allocation2] sm:$0xff]  ;;  %v226_v41 = vand.u32 7, %v221_v39 }
  0x32   :  { %v43_v27 = vmax.f32 %v42_v26, 0.0  ;;  %v284_v28 = vld [vmem:[%s531_s2] ss:$0 sm:$0xff]  ;;  %s466_s2 = smov [#allocation7]  }
  0x33   :  { %vm511_vm1 = vcmp.eq.s32.totalorder %v216_v40, %v226_v41  ;;  %s274_s10 = sshll.u32 %s466_s2, 4  ;;  %s275_s10 = int_to_ptr.vmem [resolvable:$true] %s274_s10 }
  0x34   :  { %s431_s13 = scalar_lea.vmem %s275_s10, 16  ;;  %s435_s14 = scalar_lea.vmem %s275_s10, 32 }
  0x35   :  { %p432_p6 = scmp.ne.s32.totalorder %s275_s10, %s431_s13  ;;  %p436_p7 = scmp.lt.s32.totalorder %s275_s10, %s275_s10 }
  0x36   :  { %p437_p8 = scmp.lt.s32.totalorder %s435_s14, %s431_s13 }
  0x37   :  { %349 = vmatpush3.bf16.xpose.msra.mxu0 %v348_v7 }
  0x38   :  { %350 = vmatprep.subr.bf16.mxu0 %v463_v0  ;;  %p438_p9 = por %p437_p8, %p436_p7 }
  0x3a   :  { %p439_p10 = pnand %p438_p9, %p432_p6 }
  0x3f   :  { %352 = vmatpush3.bf16.xpose.msra.mxu0 %v351_v10 }
  0x40   :  { %353 = vmatprep.subr.bf16.mxu0 %v463_v0 }
  0x47   :  { %355 = vmatpush3.bf16.xpose.msra.mxu0 %v354_v13 }
  0x48   :  { %356 = vmatprep.subr.bf16.mxu0 %v463_v0 }
  0x4f   :  { %358 = vmatpush3.bf16.xpose.msra.mxu0 %v357_v16 }
  0x50   :  { %359 = vmatprep.subr.bf16.mxu0 %v463_v0 }
  0x57   :  { %361 = vmatpush3.bf16.xpose.msra.mxu0 %v360_v19 }
  0x58   :  { %362 = vmatprep.subr.bf16.mxu0 %v463_v0 }
  0x5f   :  { %364 = vmatpush3.bf16.xpose.msra.mxu0 %v363_v22 }
  0x60   :  { %365 = vmatprep.subr.bf16.mxu0 %v463_v0 }
  0x67   :  { %367 = vmatpush3.bf16.xpose.msra.mxu0 %v366_v25 }
  0x6e   :  { %337 = vmatmul.mubr.f32.vlgmr.msra.gmra.mrb[0].mxu0 %v43_v27 }
 0x141   :  { %v133_v29 = vpop.f32.mrb[0].mxu0 }
 0x142   :  { %v134_v30 = vadd.f32 %v284_v28, %v133_v29  ;;  %v338_v31 = vpop.f32.mrb[1].mxu0 }
 0x144   :  { %v137_v32 = vmul.f32 %v134_v30, %v134_v30 }
 0x146   :  { %138 = vadd.xlane.f32.xlu0 %v137_v32 }
 0x1d3   :  { %v139_v33 = vpop.xlane.xlu0 %138 }
 0x1d4   :  { %v140_v34 = vmax.f32 %v139_v33, 1e-16 }
 0x1d6   :  { %378 = vrsqrt.f32 %v140_v34 }
 0x1e0   :  { %v379_v35 = vpop.eup %378 }
 0x1e1   :  { %v142_v36 = vmul.f32 %v379_v35, %v134_v30 }
 0x1e3   :  { %340 = vmatpush3.xpose.msra.mxu1 %v142_v36 }
 0x1e6   :  { %342 = vmatmul.mubr.f32.vlgmr.msra.gmra.mrb[0].mxu1 %v142_v36 }
 0x2b9   :  { %v209_v43 = vpop.f32.mrb[0].mxu1 }
 0x2ba   :  { %v218_v44 = vsel %vm217_vm2, -9e+15, %v209_v43  ;;  %v343_v45 = vpop.f32.mrb[1].mxu1 }
 0x2bb   :  { %v220_v46 = vmul.f32 14.285714, %v218_v44 }
 0x2bd   :  { %v240_v47 = vsel %vm236_vm3, %v220_v46, -inf  ;;  %v235_v53 = vsel %vm511_vm1, %v220_v46, 0.0 }
 0x2be   :  { %241 = vmax.xlane.f32.xlu0 %v240_v47  ;;  %v237_v54 = vsel %vm236_vm3, %v235_v53, 0.0 }
 0x34b   :  { %v242_v48 = vpop.xlane.xlu0 %241 }
 0x34c   :  { %v243_v49 = vsub.f32 %v220_v46, %v242_v48 }
 0x34e   :  { %v244_v50 = vmul.f32 1.442695, %v243_v49 }
 0x350   :  { %380 = vpow2.f32 %v244_v50 }
 0x35a   :  { %v381_v51 = vpop.eup %380 }
 0x35b   :  { %v246_v52 = vsel %vm236_vm3, %v381_v51, 0.0 }
 0x35c   :  { %247 = vadd.xlane.f32.xlu1 %v246_v52 }
 0x360   :  { %238 = vadd.xlane.f32.xlu1 %v237_v54 }
 0x3e9   :  { %v248_v55 = vpop.xlane.xlu1 %247 }
 0x3ea   :  { %382 = vlog2.f32 %v248_v55 }
 0x3ed   :  { %v239_v59 = vpop.xlane.xlu1 %238 }
 0x3f4   :  { %v383_v56 = vpop.eup %382 }
 0x3f5   :  { %v250_v57 = vmul.f32 0.6931472, %v383_v56 }
 0x3f7   :  { %v251_v58 = vadd.f32 %v250_v57, %v242_v48 }
 0x3f9   :  { %v252_v60 = vsub.f32 %v251_v58, %v239_v59 }
 0x3fb   :  { %v254_v61 = vsel %vm253_vm4, %v252_v60, 0.0 }
 0x3fc   :  { %255 = vadd.xlane.f32.xlu0 %v254_v61 }
 0x489   :  { %v256_v62 = vpop.xlane.xlu0 %255 }
 0x48a   :  { %v257_v63 = vrot.slane %v256_v62, 4 }
 0x48c   :  { %v258_v0 = vadd.f32 %v257_v63, %v256_v62 }
 0x48e   :  { %v259_v1 = vrot.slane %v258_v0, 2 }
 0x490   :  { %v260_v2 = vadd.f32 %v259_v1, %v258_v0 }
 0x492   :  { %v261_v3 = vrot.slane %v260_v2, 1 }
 0x494   :  { %v262_v4 = vadd.f32 %v261_v3, %v260_v2 }
 0x496   :  { %368 = vpush %v262_v4 }
 0x4c7   :  { %s369_s11 = spop %368 }
 0x4c8   :  { %s264_s12 = smul.f32 0.125, %s369_s11 }
 0x4ca   :  { %v265_v5 = vstv %s264_s12 }
 0x4cb   :  { %267 = vst.msk [vmem:[#allocation7] sm:$0x1] %vm266_vm5, %v265_v5 }
 0x4cc   :  { %442 = shalt.err (!%p439_p10)
}
 0x4cd   :  { %s443_s17 = scalar_lea.hbm %s532_s3, 16 }
 0x4ce   :  { %p444_p11 = scmp.ne.s32.totalorder %s532_s3, %s443_s17  ;;  %p447_p12 = scmp.lt.u32.totalorder %s443_s17, %s532_s3 }
 0x4d0   :  { %p449_p13 = pnand %p447_p12, %p444_p11 }
 0x4d2   :  { %452 = shalt.err (!%p449_p13)
}
 0x4d3   :  { %277 = dma.vmem_to_hbm [thread:$0]  %s275_s10, 16, %s532_s3, [#allocation4]  }
 0x4d4   :  { %457 = dma.done.wait [#allocation4], 16  }
 0x4d5   :  { %458 = vsyncadd [#allocation4], 4294967280 }
 0x4d6   :  { %281 = vsyncpa [#allocation3], 1 }
 0x4d7   :  { %282 = vsyncpa [#allocation6], 1 }
 0x4d8   :  { %283 = vsyncpa [#allocation4], 1 }

</bundles_post_ra>
